<compile_context>
chip_gen: v5e
topology: v5e:2x2
jax: 0.10.0
libtpu: 0.0.40
codegen_flags: <defaults>
</compile_context>

<pallas_src>
import math

import jax
import jax.numpy as jnp
from jax import lax
from jax.experimental import pallas as pl
from jax.experimental.pallas import tpu as pltpu

LANES = 128
CHUNK_ROWS = 1024                 # per-chunk f32 working set = 1024*128*4 = 512 KiB
TARGET_BLOCK_BYTES = 8 << 20      # ~8 MiB streamed per grid step (native dtype)
VMEM_LIMIT_BYTES = 40 << 20       # 2 x 8 MiB double-buffered input + small temps


def _num_tensorcores() -> int:
    """2 on v7x-class chips (2 TCs per device), 1 otherwise (v5e/v6e)."""
    try:
        kind = jax.devices()[0].device_kind.lower().replace(" ", "")
    except Exception:
        return 1
    return 2 if ("v7" in kind or "tpu7" in kind) else 1


def _make_mse_kernel(rows: int, tile_rows: int, inner: int, nb: int, two_core: bool):
    """Kernel accumulating partial sums of x*x into a (8,128) f32 accumulator."""
    need_mask = (rows % tile_rows != 0) or (two_core and 2 * inner != nb)

    # Static per-block chunk schedule: sub-slices of <= CHUNK_ROWS rows so the
    # f32 cast / square intermediates stay a few vregs-worth of VMEM.
    chunk = min(CHUNK_ROWS, tile_rows)
    sizes = [chunk] * (tile_rows // chunk)
    if tile_rows % chunk:
        sizes.append(tile_rows % chunk)

    def kernel(x_ref, o_ref):
        if two_core:
            i = pl.program_id(0)
            j = pl.program_id(1)
            blk = i * inner + j                 # logical block id (un-clamped)
        else:
            j = pl.program_id(0)
            blk = j

        @pl.when(j == 0)
        def _():
            o_ref[...] = jnp.zeros_like(o_ref)

        rem = rows - blk * tile_rows            # valid rows in this logical block

        def accumulate(masked: bool):
            acc = jnp.zeros((8, LANES), jnp.float32)
            start = 0
            for cs in sizes:
                xc = x_ref[pl.ds(start, cs), :].astype(jnp.float32)
                if masked:
                    row_ids = lax.broadcasted_iota(jnp.int32, (cs, LANES), 0) + start
                    # Mask BEFORE squaring: garbage/NaN past the array is
                    # discarded by the select and can never reach the sum.
                    xc = jnp.where(row_ids < rem, xc, 0.0)
                sq = xc * xc
                pad = (-cs) % 8
                if pad:
                    sq = jnp.concatenate(
                        [sq, jnp.zeros((pad, LANES), sq.dtype)], axis=0)
                # leading-axis sum -> (8,128): pure VPU adds, no per-step XLU.
                acc = acc + sq.reshape(-1, 8, LANES).sum(axis=0)
                start += cs
            o_ref[...] += (acc[None] if two_core else acc)

        if need_mask:
            # Gate the mask: only the tail / clamped-overflow block pays for
            # the iota+cmp+select; full blocks take the cheap path.
            @pl.when(rem >= tile_rows)
            def _():
                accumulate(False)

            @pl.when(rem < tile_rows)
            def _():
                accumulate(True)
        else:
            accumulate(False)

    return kernel


def _partial_sums(x2d, rows: int, tile_rows: int, nb: int, two_core: bool):
    if two_core:
        outer = 2
        inner = pl.cdiv(nb, outer)
        kernel = _make_mse_kernel(rows, tile_rows, inner, nb, True)

        def x_index_map(i, j):
            blk = i * inner + j
            # Clamp overflow blocks (2*inner > nb); they are masked to zero.
            return (jnp.minimum(blk, nb - 1), 0)

        grid = (outer, inner)
        in_specs = [pl.BlockSpec((tile_rows, LANES), x_index_map)]
        out_specs = pl.BlockSpec((1, 8, LANES), lambda i, j: (i, 0, 0))
        out_shape = jax.ShapeDtypeStruct((outer, 8, LANES), jnp.float32)
        dims = (getattr(pltpu, "CORE_PARALLEL", "parallel"),
                getattr(pltpu, "ARBITRARY", "arbitrary"))
    else:
        kernel = _make_mse_kernel(rows, tile_rows, nb, nb, False)
        grid = (nb,)
        in_specs = [pl.BlockSpec((tile_rows, LANES), lambda j: (j, 0))]
        out_specs = pl.BlockSpec((8, LANES), lambda j: (0, 0))
        out_shape = jax.ShapeDtypeStruct((8, LANES), jnp.float32)
        dims = ("arbitrary",)

    return pl.pallas_call(
        kernel,
        out_shape=out_shape,
        grid_spec=pltpu.PrefetchScalarGridSpec(
            num_scalar_prefetch=0,
            grid=grid,
            in_specs=in_specs,
            out_specs=out_specs,
        ),
        compiler_params=pltpu.CompilerParams(
            dimension_semantics=dims,
            vmem_limit_bytes=VMEM_LIMIT_BYTES,
        ),
    )(x2d)


def mse_loss(x: jax.Array) -> jax.Array:
    """Equivalent of MSELoss()(x) == torch.mean(abs(x) ** 2)."""
    total_n = math.prod(x.shape)

    if jnp.iscomplexobj(x):
        # |z|^2 = re^2 + im^2, so the sum of squares over the real/imag view
        # equals the sum of |z|^2; total_n stays the complex element count.
        x = jnp.stack([jnp.real(x), jnp.imag(x)], axis=-1)

    flat = x.reshape(-1)
    n = flat.shape[0]
    if n % LANES != 0:
        # Rare fallback: a copy is unavoidable to form a lane-dense 2D view.
        flat = jnp.pad(flat, (0, LANES - n % LANES))
    x2d = flat.reshape(-1, LANES)
    rows = x2d.shape[0]

    # ~8 MiB per streamed block in native dtype (cast to f32 in small chunks
    # inside the kernel), rounded to a CHUNK_ROWS multiple.
    itemsize = jnp.dtype(x2d.dtype).itemsize
    target_rows = (TARGET_BLOCK_BYTES // (LANES * itemsize)) // CHUNK_ROWS * CHUNK_ROWS
    target_rows = max(CHUNK_ROWS, target_rows)
    if rows <= target_rows:
        tile_rows = rows          # full-dim block: always a legal block shape
    else:
        tile_rows = target_rows   # CHUNK_ROWS multiple; tail masked in-kernel

    nb = pl.cdiv(rows, tile_rows)

    two_core = (_num_tensorcores() >= 2) and (nb >= 2)
    try:
        partial = _partial_sums(x2d, rows, tile_rows, nb, two_core)
    except Exception:
        if not two_core:
            raise
        # Safety net: fall back to the single-core path if the CORE_PARALLEL
        # variant fails to lower on this chip/runtime.
        partial = _partial_sums(x2d, rows, tile_rows, nb, False)

    # Single tiny cross-lane reduce + mean, outside the hot loop.
    return jnp.sum(partial) / jnp.float32(total_n)


if __name__ == "__main__":
    key = jax.random.PRNGKey(0)
    x = jax.random.normal(key, (2, 4, 16, 16), dtype=jnp.float32)  # NCHW

    result = mse_loss(x)
    result = jax.block_until_ready(result)

    # sanity check against pure-JAX reference
    ref = jnp.mean(jnp.abs(x) ** 2)
    assert jnp.allclose(result, ref, rtol=1e-5, atol=1e-6), (result, ref)

    print("KERNEL_OK")
</pallas_src>

<mosaic_0001>
module attributes {stable_mosaic.version = 11 : i64} {
  func.func @kernel(%arg0: i32, %arg1: memref<16x128xf32, #tpu.memory_space<vmem>>, %arg2: memref<8x128xf32, #tpu.memory_space<vmem>>) attributes {dimension_semantics = [#tpu.dimension_semantics<arbitrary>], iteration_bounds = array<i64: 1>, scalar_prefetch = 0 : i64, scratch_operands = 0 : i64, tpu.core_type = #tpu.core_type<tc>, window_params = [{transform_indices = @transform_0, window_bounds = array<i64: 16, 128>}, {pipeline_mode = #tpu.pipeline_mode<synchronous>, transform_indices = @transform_1, window_bounds = array<i64: 8, 128>}]} {
    %c0_i32 = arith.constant 0 : i32
    %0 = arith.cmpi eq, %arg0, %c0_i32 : i32
    %1 = arith.extui %0 : i1 to i32
    %c0_i32_0 = arith.constant 0 : i32
    %2 = arith.cmpi ne, %1, %c0_i32_0 : i32
    scf.if %2 {
      %cst_7 = arith.constant 0.000000e+00 : f32
      %12 = vector.broadcast %cst_7 : f32 to vector<8x128xf32>
      %c0_8 = arith.constant 0 : index
      %c0_9 = arith.constant 0 : index
      %13 = vector.load %arg2[%c0_8, %c0_9] : memref<8x128xf32, #tpu.memory_space<vmem>>, vector<8x128xf32>
      tpu.vector_store %arg2[%c0_8, %c0_9], %12 {strides = array<i32>} : memref<8x128xf32, #tpu.memory_space<vmem>>, vector<8x128xf32>,
    } else {
    }
    %cst = arith.constant 0.000000e+00 : f32
    %3 = vector.broadcast %cst : f32 to vector<8x128xf32>
    %c0 = arith.constant 0 : index
    %c0_1 = arith.constant 0 : index
    %4 = vector.load %arg1[%c0, %c0_1] : memref<16x128xf32, #tpu.memory_space<vmem>>, vector<16x128xf32>
    %5 = arith.mulf %4, %4 : vector<16x128xf32>
    %6 = vector.shape_cast %5 : vector<16x128xf32> to vector<2x8x128xf32>
    %cst_2 = arith.constant dense<0.000000e+00> : vector<8x128xf32>
    %7 = vector.multi_reduction <add>, %6, %cst_2 [0] : vector<2x8x128xf32> to vector<8x128xf32>
    %8 = arith.addf %3, %7 : vector<8x128xf32>
    %c0_3 = arith.constant 0 : index
    %c0_4 = arith.constant 0 : index
    %9 = vector.load %arg2[%c0_3, %c0_4] : memref<8x128xf32, #tpu.memory_space<vmem>>, vector<8x128xf32>
    %10 = arith.addf %9, %8 : vector<8x128xf32>
    %c0_5 = arith.constant 0 : index
    %c0_6 = arith.constant 0 : index
    %11 = vector.load %arg2[%c0_5, %c0_6] : memref<8x128xf32, #tpu.memory_space<vmem>>, vector<8x128xf32>
    tpu.vector_store %arg2[%c0_5, %c0_6], %10 {strides = array<i32>} : memref<8x128xf32, #tpu.memory_space<vmem>>, vector<8x128xf32>,
    return
  }
  func.func @transform_0(%arg0: i32) -> (i32, i32) {
    %c0_i32 = arith.constant 0 : i32
    %c0_i32_0 = arith.constant 0 : i32
    return %arg0, %c0_i32 : i32, i32
  }
  func.func @transform_1(%arg0: i32) -> (i32, i32) {
    %c0_i32 = arith.constant 0 : i32
    %c0_i32_0 = arith.constant 0 : i32
    %c0_i32_1 = arith.constant 0 : i32
    return %c0_i32, %c0_i32_0 : i32, i32
  }
}

</mosaic_0001>

<bundles_post_ra>
// kernel: tpu_custom_call.1
= control target key start
LH: loop header
LB: loop body
LE: loop exit
PB: predicated region body
PF: predicated region fallthrough
CT: control target
= control target key end

     0   :  { %6 = vsyncpa [#allocation3], 0  ;;  %s133_s0 = inlined_call_operand.hbm [shape: f32[16,128], index: 0, kind: input, shape index: {}]   ;;  %s134_s1 = inlined_call_operand.hbm [shape: f32[8,128], index: 1, kind: output, shape index: {}]  }
   0x1   :  { %7 = vsyncpa [#allocation4], 0  ;;  %s12_s8 = sshll.u32 %s133_s0, 4  ;;  %s113_s9 = smov [#allocation2]   ;;  %s13_s8 = int_to_ptr.hbm [resolvable:$true] %s12_s8 }
   0x2   :  { %s14_s10 = sshll.u32 %s113_s9, 4  ;;  %s114_s11 = smov 128   ;;  %s15_s10 = int_to_ptr.vmem [resolvable:$true] %s14_s10 }
   0x3   :  { %s115_s12 = smov 8  }
   0x4   :  { %20 = dma.hbm_to_vmem [thread:$0]  %s13_s8, 256, %s15_s10, [#allocation3], %s114_s11, %s114_s11, %s115_s12  }
   0x5   :  { %109 = dma.done.wait [#allocation3], 256  }
   0x6   :  { %110 = vsyncadd [#allocation3], 4294967040  ;;  %v30_v0 = vld [vmem:[#allocation2] sm:$0xff]  ;;  %v31_v1 = vld [vmem:[#allocation2 + $0x8] sm:$0xff]  ;;  %s116_s13 = smov [#allocation5]   ;;  %s46_s17 = sshll.u32 %s134_s1, 4  ;;  %s47_s17 = int_to_ptr.hbm [resolvable:$true] %s46_s17 }
   0x7   :  { %v32_v2 = vmul.f32 %v30_v0, %v30_v0  ;;  %v33_v3 = vmul.f32 %v31_v1, %v31_v1  ;;  %s44_s14 = sshll.u32 %s116_s13, 4  ;;  %s45_s14 = int_to_ptr.vmem [resolvable:$true] %s44_s14 }
   0x9   :  { %v34_v4 = vadd.f32 %v33_v3, %v32_v2 }
   0xb   :  { %38 = vst [vmem:[#allocation5] sm:$0xff] %v34_v4 }
   0xc   :  { %49 = dma.vmem_to_hbm [thread:$0]  %s45_s14, 128, %s47_s17, [#allocation4]  }
   0xd   :  { %111 = dma.done.wait [#allocation4], 128  }
   0xe   :  { %112 = vsyncadd [#allocation4], 4294967168 }
   0xf   :  { %54 = vsyncpa [#allocation3], 1 }
  0x10   :  { %55 = vsyncpa [#allocation4], 1 }

</bundles_post_ra>
